<compile_context>
chip_gen: v7x
topology: tpu7x:2x2x1
jax: 0.10.0
libtpu: 0.0.40
codegen_flags: <defaults>
</compile_context>

<pallas_src>
import functools

import jax
import jax.numpy as jnp
from jax.experimental import pallas as pl
from jax.experimental.pallas import tpu as pltpu


def _round_up(a, b):
    return ((a + b - 1) // b) * b


def _classifier_kernel(x_ref, w1f_ref, b1_ref, w2t_ref, b2_ref,
                       feat_ref, out_ref):
    # x_ref:   (TM, C*HW)  bf16  -- one batch tile
    # w1f_ref: (C*HW, Ep)  bf16  -- fc1 weights with the 1/(H*W) pooling folded in
    # b1_ref:  (1, Ep)     f32
    # w2t_ref: (Ep, Kp)    bf16
    # b2_ref:  (1, Kp)     f32
    # Fused avg-pool + fc1: single MXU matmul over contraction C*HW, f32 accum.
    h = jnp.dot(x_ref[...], w1f_ref[...],
                preferred_element_type=jnp.float32) + b1_ref[...]   # (TM, Ep)
    feature = jnp.maximum(h, 0.0)
    feat_ref[...] = feature.astype(feat_ref.dtype)

    # fc2 (second MXU matmul, f32 accum).
    o = jnp.dot(feature.astype(w2t_ref.dtype), w2t_ref[...],
                preferred_element_type=jnp.float32) + b2_ref[...]   # (TM, Kp)
    out_ref[...] = o.astype(out_ref.dtype)


@functools.partial(jax.jit)
def classifier_forward(x_nchw, w1, b1, w2, b2):
    """x_nchw: (N, C, H, W).  w1: (E, C), b1: (E,), w2: (K, E), b2: (K,).

    Returns (feature (N, E), out (N, K)) matching the PyTorch module.
    """
    N, C, H, W = x_nchw.shape
    E = w1.shape[0]
    K = w2.shape[0]
    HW = H * W
    CHW = C * HW

    # Lane-dense output widths (multiples of 128) -> unmasked full-lane stores.
    Ep = _round_up(E, 128)
    Kp = _round_up(K, 128)

    # Batch tiling: TM rows per grid step (multiple of 8 sublanes).  Cap the
    # per-step x tile at ~2 MiB bf16 so (double-buffered) it stays far under
    # the scoped VMEM limit even when C*H*W is large; floor at 8 rows.
    tm_cap = max(8, _round_up(min(512, (2 * 1024 * 1024) // max(1, 2 * CHW)), 8))
    TM = min(tm_cap, _round_up(N, 8))
    Np = _round_up(N, TM)
    grid = (Np // TM,)

    # x as (Np, C*HW) bf16 (zero row padding is sliced off afterward).
    x_flat = x_nchw.reshape(N, CHW)
    if Np != N:
        x_flat = jnp.pad(x_flat, ((0, Np - N), (0, 0)))
    x_flat = x_flat.astype(jnp.bfloat16)

    # Zero-pad weights/biases to the lane-dense sizes (padded cols of fc1 give
    # relu(0 + 0) = 0; padded rows/cols of fc2 contribute 0 -> exact after slice).
    w1_p = jnp.zeros((Ep, C), jnp.float32).at[:E, :].set(jnp.asarray(w1, jnp.float32))
    w2_p = jnp.zeros((Kp, Ep), jnp.float32).at[:K, :E].set(jnp.asarray(w2, jnp.float32))
    b1_p = jnp.zeros((1, Ep), jnp.float32).at[0, :E].set(jnp.asarray(b1, jnp.float32))
    b2_p = jnp.zeros((1, Kp), jnp.float32).at[0, :K].set(jnp.asarray(b2, jnp.float32))

    # Fold the global average pool into fc1:
    #   mean(x, HW) @ W1^T  ==  x_flat @ repeat(W1^T / HW, HW, axis=0)
    w1f = jnp.repeat(w1_p.T / float(HW), HW, axis=0).astype(jnp.bfloat16)  # (CHW, Ep)
    w2t = w2_p.T.astype(jnp.bfloat16)                                      # (Ep, Kp)

    cost = pl.CostEstimate(
        flops=2 * Np * (CHW * Ep + Ep * Kp),
        transcendentals=0,
        bytes_accessed=(x_flat.size * 2 + w1f.size * 2 + w2t.size * 2
                        + (b1_p.size + b2_p.size) * 4
                        + Np * (Ep + Kp) * 4),
    )

    feature_p, out_p = pl.pallas_call(
        _classifier_kernel,
        grid=grid,
        in_specs=[
            pl.BlockSpec((TM, CHW), lambda i: (i, 0)),   # batch-tiled, double-buffered
            pl.BlockSpec((CHW, Ep), lambda i: (0, 0)),   # weights: VMEM-resident
            pl.BlockSpec((1, Ep), lambda i: (0, 0)),
            pl.BlockSpec((Ep, Kp), lambda i: (0, 0)),
            pl.BlockSpec((1, Kp), lambda i: (0, 0)),
        ],
        out_specs=[
            pl.BlockSpec((TM, Ep), lambda i: (i, 0)),
            pl.BlockSpec((TM, Kp), lambda i: (i, 0)),
        ],
        out_shape=(
            jax.ShapeDtypeStruct((Np, Ep), jnp.float32),
            jax.ShapeDtypeStruct((Np, Kp), jnp.float32),
        ),
        compiler_params=pltpu.CompilerParams(
            # Batch tiles are independent -> shard across TensorCores.
            dimension_semantics=("parallel",),
        ),
        cost_estimate=cost,
    )(x_flat, w1f, b1_p, w2t, b2_p)

    # Slice off row padding and lane padding.
    return feature_p[:N, :E], out_p[:N, :K]


if __name__ == "__main__":
    # Small shapes consistent with the module: batch=2, in_ch=4, 16x16 spatial,
    # embeddingdim=32, num_classes=8.
    N, C, H, W = 2, 4, 16, 16
    E, K = 32, 8

    key = jax.random.PRNGKey(0)
    kx, k1, k2, k3, k4 = jax.random.split(key, 5)

    x = jax.random.normal(kx, (N, C, H, W), dtype=jnp.float32)
    # Deterministic "init" of Linear params (synthetic, not a checkpoint).
    w1 = jax.random.normal(k1, (E, C), dtype=jnp.float32) * 0.1
    b1 = jax.random.normal(k2, (E,), dtype=jnp.float32) * 0.1
    w2 = jax.random.normal(k3, (K, E), dtype=jnp.float32) * 0.1
    b2 = jax.random.normal(k4, (K,), dtype=jnp.float32) * 0.1

    feature, out = classifier_forward(x, w1, b1, w2, b2)
    jax.block_until_ready((feature, out))

    # Pure-JAX f32 reference (tolerance widened for bf16 inputs/weights).
    pooled_ref = jnp.mean(x, axis=(2, 3))                       # (N, C)
    feat_ref = jnp.maximum(pooled_ref @ w1.T + b1, 0.0)         # (N, E)
    out_ref = feat_ref @ w2.T + b2                              # (N, K)
    assert feature.shape == (N, E) and out.shape == (N, K)
    assert jnp.allclose(feature, feat_ref, atol=2e-2, rtol=2e-2), "feature mismatch"
    assert jnp.allclose(out, out_ref, atol=2e-2, rtol=2e-2), "out mismatch"

    print("KERNEL_OK")
</pallas_src>

<mosaic_0001>
module attributes {stable_mosaic.version = 11 : i64} {
  func.func @_classifier_kernel(%arg0: i32, %arg1: memref<8x1024xbf16, #tpu.memory_space<vmem>>, %arg2: memref<1024x128xbf16, #tpu.memory_space<vmem>>, %arg3: memref<1x128xf32, #tpu.memory_space<vmem>>, %arg4: memref<128x128xbf16, #tpu.memory_space<vmem>>, %arg5: memref<1x128xf32, #tpu.memory_space<vmem>>, %arg6: memref<8x128xf32, #tpu.memory_space<vmem>>, %arg7: memref<8x128xf32, #tpu.memory_space<vmem>>) attributes {dimension_semantics = [#tpu.dimension_semantics<parallel>], iteration_bounds = array<i64: 1>, scalar_prefetch = 0 : i64, scratch_operands = 0 : i64, tpu.core_type = #tpu.core_type<tc>, window_params = [{transform_indices = @transform_0, window_bounds = array<i64: 8, 1024>}, {pipeline_mode = #tpu.pipeline_mode<synchronous>, transform_indices = @transform_1, window_bounds = array<i64: 1024, 128>}, {pipeline_mode = #tpu.pipeline_mode<synchronous>, transform_indices = @transform_2, window_bounds = array<i64: 1, 128>}, {pipeline_mode = #tpu.pipeline_mode<synchronous>, transform_indices = @transform_3, window_bounds = array<i64: 128, 128>}, {pipeline_mode = #tpu.pipeline_mode<synchronous>, transform_indices = @transform_4, window_bounds = array<i64: 1, 128>}, {transform_indices = @transform_5, window_bounds = array<i64: 8, 128>}, {transform_indices = @transform_6, window_bounds = array<i64: 8, 128>}]} {
    %c0 = arith.constant 0 : index
    %c0_0 = arith.constant 0 : index
    %0 = vector.load %arg1[%c0, %c0_0] : memref<8x1024xbf16, #tpu.memory_space<vmem>>, vector<8x1024xbf16>
    %c0_1 = arith.constant 0 : index
    %c0_2 = arith.constant 0 : index
    %1 = vector.load %arg2[%c0_1, %c0_2] : memref<1024x128xbf16, #tpu.memory_space<vmem>>, vector<1024x128xbf16>
    %cst = arith.constant dense<0.000000e+00> : vector<8x128xf32>
    %2 = tpu.matmul %0, %1, %cst {dimension_numbers = #tpu.dot_dimension_numbers<[1], [0], [0], [1], [0, 0, 1, 1], [], []>} : vector<8x1024xbf16>, vector<1024x128xbf16>, vector<8x128xf32> -> vector<8x128xf32>
    %c0_3 = arith.constant 0 : index
    %c0_4 = arith.constant 0 : index
    %3 = vector.load %arg3[%c0_3, %c0_4] : memref<1x128xf32, #tpu.memory_space<vmem>>, vector<1x128xf32>
    %4 = vector.broadcast %3 : vector<1x128xf32> to vector<8x128xf32>
    %5 = arith.addf %2, %4 : vector<8x128xf32>
    %cst_5 = arith.constant 0.000000e+00 : f32
    %6 = vector.broadcast %cst_5 : f32 to vector<8x128xf32>
    %7 = arith.maximumf %5, %6 : vector<8x128xf32>
    %c0_6 = arith.constant 0 : index
    %c0_7 = arith.constant 0 : index
    %8 = vector.load %arg6[%c0_6, %c0_7] : memref<8x128xf32, #tpu.memory_space<vmem>>, vector<8x128xf32>
    tpu.vector_store %arg6[%c0_6, %c0_7], %7 {strides = array<i32>} : memref<8x128xf32, #tpu.memory_space<vmem>>, vector<8x128xf32>,
    %9 = arith.truncf %7 : vector<8x128xf32> to vector<8x128xbf16>
    %c0_8 = arith.constant 0 : index
    %c0_9 = arith.constant 0 : index
    %10 = vector.load %arg4[%c0_8, %c0_9] : memref<128x128xbf16, #tpu.memory_space<vmem>>, vector<128x128xbf16>
    %cst_10 = arith.constant dense<0.000000e+00> : vector<8x128xf32>
    %11 = tpu.matmul %9, %10, %cst_10 {dimension_numbers = #tpu.dot_dimension_numbers<[1], [0], [0], [1], [0, 0, 1, 1], [], []>} : vector<8x128xbf16>, vector<128x128xbf16>, vector<8x128xf32> -> vector<8x128xf32>
    %c0_11 = arith.constant 0 : index
    %c0_12 = arith.constant 0 : index
    %12 = vector.load %arg5[%c0_11, %c0_12] : memref<1x128xf32, #tpu.memory_space<vmem>>, vector<1x128xf32>
    %13 = vector.broadcast %12 : vector<1x128xf32> to vector<8x128xf32>
    %14 = arith.addf %11, %13 : vector<8x128xf32>
    %c0_13 = arith.constant 0 : index
    %c0_14 = arith.constant 0 : index
    %15 = vector.load %arg7[%c0_13, %c0_14] : memref<8x128xf32, #tpu.memory_space<vmem>>, vector<8x128xf32>
    tpu.vector_store %arg7[%c0_13, %c0_14], %14 {strides = array<i32>} : memref<8x128xf32, #tpu.memory_space<vmem>>, vector<8x128xf32>,
    return
  }
  func.func @transform_0(%arg0: i32) -> (i32, i32) {
    %c0_i32 = arith.constant 0 : i32
    %c0_i32_0 = arith.constant 0 : i32
    return %arg0, %c0_i32 : i32, i32
  }
  func.func @transform_1(%arg0: i32) -> (i32, i32) {
    %c0_i32 = arith.constant 0 : i32
    %c0_i32_0 = arith.constant 0 : i32
    %c0_i32_1 = arith.constant 0 : i32
    return %c0_i32, %c0_i32_0 : i32, i32
  }
  func.func @transform_2(%arg0: i32) -> (i32, i32) {
    %c0_i32 = arith.constant 0 : i32
    %c0_i32_0 = arith.constant 0 : i32
    %c0_i32_1 = arith.constant 0 : i32
    return %c0_i32, %c0_i32_0 : i32, i32
  }
  func.func @transform_3(%arg0: i32) -> (i32, i32) {
    %c0_i32 = arith.constant 0 : i32
    %c0_i32_0 = arith.constant 0 : i32
    %c0_i32_1 = arith.constant 0 : i32
    return %c0_i32, %c0_i32_0 : i32, i32
  }
  func.func @transform_4(%arg0: i32) -> (i32, i32) {
    %c0_i32 = arith.constant 0 : i32
    %c0_i32_0 = arith.constant 0 : i32
    %c0_i32_1 = arith.constant 0 : i32
    return %c0_i32, %c0_i32_0 : i32, i32
  }
  func.func @transform_5(%arg0: i32) -> (i32, i32) {
    %c0_i32 = arith.constant 0 : i32
    %c0_i32_0 = arith.constant 0 : i32
    return %arg0, %c0_i32 : i32, i32
  }
  func.func @transform_6(%arg0: i32) -> (i32, i32) {
    %c0_i32 = arith.constant 0 : i32
    %c0_i32_0 = arith.constant 0 : i32
    return %arg0, %c0_i32 : i32, i32
  }
}

</mosaic_0001>

<bundles_post_ra>
// kernel: classifier_forward.1
= control target key start
LH: loop header
LB: loop body
LE: loop exit
PB: predicated region body
PF: predicated region fallthrough
CT: control target
= control target key end

     0   :  { %vm1139_vm0 = vmmov 0   ;;  %s1415_s1 = inlined_call_operand.vmem [shape: bf16[1024,128], index: 1, kind: input, shape index: {}]   ;;  %s1416_s0 = inlined_call_operand.vmem [shape: bf16[8,1024], index: 0, kind: input, shape index: {}]   ;;  %s1417_s3 = inlined_call_operand.vmem [shape: bf16[128,128], index: 3, kind: input, shape index: {}]   ;;  %s1418_s2 = inlined_call_operand.vmem [shape: f32[1,128], index: 2, kind: input, shape index: {}]   ;;  %s1419_s5 = inlined_call_operand.vmem [shape: f32[8,128], index: 5, kind: output, shape index: {0}]   ;;  %s1420_s4 = inlined_call_operand.vmem [shape: f32[1,128], index: 4, kind: input, shape index: {}]   ;;  %s1421_s6 = inlined_call_operand.vmem [shape: f32[8,128], index: 6, kind: output, shape index: {1}]  }
   0x1   :  { %v1058_v0 = vld [vmem:[%s1415_s1 + $0x40] sm:$0xff]   ;;  %v1062_v4 = vld [vmem:[%s1415_s1 + $0x48] sm:$0xff]   ;;  %v1066_v8 = vld [vmem:[%s1415_s1 + $0x50] sm:$0xff]  }
   0x2   :  { %v1059_v1 = vld [vmem:[%s1415_s1 + $0xc0] sm:$0xff]   ;;  %939 = vmatprep.subr.bf16.mxu0 %v1058_v0  ;;  %v1063_v5 = vld [vmem:[%s1415_s1 + $0xc8] sm:$0xff]   ;;  %v1067_v9 = vld [vmem:[%s1415_s1 + $0xd0] sm:$0xff]  }
   0x3   :  { %v1060_v2 = vld [vmem:[%s1415_s1] sm:$0xff]   ;;  %961 = vmatprep.subr.bf16.mxu1 %v1059_v1  ;;  %v1064_v6 = vld [vmem:[%s1415_s1 + $0x8] sm:$0xff]   ;;  %v1068_v10 = vld [vmem:[%s1415_s1 + $0x10] sm:$0xff]  }
   0x4   :  { %v1061_v3 = vld [vmem:[%s1415_s1 + $0x80] sm:$0xff]   ;;  %940 = vmatpush3.bf16.msra.mxu0 %v1060_v2  ;;  %v1065_v7 = vld [vmem:[%s1415_s1 + $0x88] sm:$0xff]   ;;  %v1069_v11 = vld [vmem:[%s1415_s1 + $0x90] sm:$0xff]  }
   0x5   :  { %962 = vmatpush3.bf16.msra.mxu1 %v1061_v3  ;;  %941 = vmatprep.subr.bf16.mxu0 %v1062_v4  ;;  %v1070_v12 = vld [vmem:[%s1415_s1 + $0x58] sm:$0xff]   ;;  %v1074_v16 = vld [vmem:[%s1415_s1 + $0x60] sm:$0xff]   ;;  %v1078_v20 = vld [vmem:[%s1415_s1 + $0x68] sm:$0xff]  }
   0x6   :  { %963 = vmatprep.subr.bf16.mxu1 %v1063_v5  ;;  %v1071_v13 = vld [vmem:[%s1415_s1 + $0xd8] sm:$0xff]   ;;  %v1075_v17 = vld [vmem:[%s1415_s1 + $0xe0] sm:$0xff]   ;;  %v1079_v21 = vld [vmem:[%s1415_s1 + $0xe8] sm:$0xff]  }
   0x7   :  { %v1072_v14 = vld [vmem:[%s1415_s1 + $0x18] sm:$0xff]   ;;  %v1076_v18 = vld [vmem:[%s1415_s1 + $0x20] sm:$0xff]   ;;  %v1080_v22 = vld [vmem:[%s1415_s1 + $0x28] sm:$0xff]  }
   0x8   :  { %942 = vmatpush3.bf16.msra.mxu0 %v1064_v6  ;;  %v1073_v15 = vld [vmem:[%s1415_s1 + $0x98] sm:$0xff]   ;;  %v1077_v19 = vld [vmem:[%s1415_s1 + $0xa0] sm:$0xff]   ;;  %v1081_v23 = vld [vmem:[%s1415_s1 + $0xa8] sm:$0xff]  }
   0x9   :  { %964 = vmatpush3.bf16.msra.mxu1 %v1065_v7  ;;  %943 = vmatprep.subr.bf16.mxu0 %v1066_v8  ;;  %v1082_v24 = vld [vmem:[%s1415_s1 + $0x70] sm:$0xff]   ;;  %v1086_v28 = vld [vmem:[%s1415_s1 + $0x78] sm:$0xff]   ;;  %v23_v32 = vld [vmem:[%s1416_s0] sm:$0xff] }
   0xa   :  { %965 = vmatprep.subr.bf16.mxu1 %v1067_v9  ;;  %v1083_v25 = vld [vmem:[%s1415_s1 + $0xf0] sm:$0xff]   ;;  %v1087_v29 = vld [vmem:[%s1415_s1 + $0xf8] sm:$0xff]   ;;  %v24_v33 = vld [vmem:[%s1416_s0 + $0x8] sm:$0xff]  ;;  %v858_v34 = vcombine.low %v23_v32, %v23_v32  ;;  %v859_v35 = vcombine.high %v23_v32, %v23_v32 }
   0xb   :  { %v1084_v26 = vld [vmem:[%s1415_s1 + $0x30] sm:$0xff]   ;;  %v1088_v30 = vld [vmem:[%s1415_s1 + $0x38] sm:$0xff]   ;;  %v860_v36 = vcombine.low %v24_v33, %v24_v33  ;;  %v861_v37 = vcombine.high %v24_v33, %v24_v33  ;;  %v1094_v38 = vld [vmem:[%s1415_s1 + $0x140] sm:$0xff]  }
   0xc   :  { %944 = vmatpush3.bf16.msra.mxu0 %v1068_v10  ;;  %v1085_v27 = vld [vmem:[%s1415_s1 + $0xb0] sm:$0xff]   ;;  %v1089_v31 = vld [vmem:[%s1415_s1 + $0xb8] sm:$0xff]   ;;  %v1095_v39 = vld [vmem:[%s1415_s1 + $0x1c0] sm:$0xff]   ;;  %606 = vmatprep.mubr.bf16.mxu0 %v859_v35 }
   0xd   :  { %966 = vmatpush3.bf16.msra.mxu1 %v1069_v11  ;;  %945 = vmatprep.subr.bf16.mxu0 %v1070_v12  ;;  %v1096_v40 = vld [vmem:[%s1415_s1 + $0x100] sm:$0xff]   ;;  %v1098_v42 = vld [vmem:[%s1415_s1 + $0x148] sm:$0xff]   ;;  %v1102_v46 = vld [vmem:[%s1415_s1 + $0x150] sm:$0xff]   ;;  %v1138_v12 = vmov 0.0  }
   0xe   :  { %967 = vmatprep.subr.bf16.mxu1 %v1071_v13  ;;  %646 = vmatprep.mubr.bf16.mxu1 %v861_v37  ;;  %v1097_v41 = vld [vmem:[%s1415_s1 + $0x180] sm:$0xff]   ;;  %v1099_v43 = vld [vmem:[%s1415_s1 + $0x1c8] sm:$0xff]   ;;  %v1103_v47 = vld [vmem:[%s1415_s1 + $0x1d0] sm:$0xff]  }
   0xf   :  { %v1100_v44 = vld [vmem:[%s1415_s1 + $0x108] sm:$0xff]   ;;  %v1104_v48 = vld [vmem:[%s1415_s1 + $0x110] sm:$0xff]   ;;  %v1106_v50 = vld [vmem:[%s1415_s1 + $0x158] sm:$0xff]  }
  0x10   :  { %946 = vmatpush3.bf16.msra.mxu0 %v1072_v14  ;;  %v1101_v45 = vld [vmem:[%s1415_s1 + $0x188] sm:$0xff]   ;;  %v1105_v49 = vld [vmem:[%s1415_s1 + $0x190] sm:$0xff]   ;;  %v1107_v51 = vld [vmem:[%s1415_s1 + $0x1d8] sm:$0xff]  }
  0x11   :  { %968 = vmatpush3.bf16.msra.mxu1 %v1073_v15  ;;  %947 = vmatprep.subr.bf16.mxu0 %v1074_v16  ;;  %v1108_v52 = vld [vmem:[%s1415_s1 + $0x118] sm:$0xff]   ;;  %v1110_v54 = vld [vmem:[%s1415_s1 + $0x160] sm:$0xff]   ;;  %v1114_v58 = vld [vmem:[%s1415_s1 + $0x168] sm:$0xff]  }
  0x12   :  { %969 = vmatprep.subr.bf16.mxu1 %v1075_v17  ;;  %v1109_v53 = vld [vmem:[%s1415_s1 + $0x198] sm:$0xff]   ;;  %v1111_v55 = vld [vmem:[%s1415_s1 + $0x1e0] sm:$0xff]   ;;  %v1115_v59 = vld [vmem:[%s1415_s1 + $0x1e8] sm:$0xff]  }
  0x13   :  { %v1112_v56 = vld [vmem:[%s1415_s1 + $0x120] sm:$0xff]   ;;  %v1116_v60 = vld [vmem:[%s1415_s1 + $0x128] sm:$0xff]   ;;  %v1118_v62 = vld [vmem:[%s1415_s1 + $0x170] sm:$0xff]  }
  0x14   :  { %948 = vmatpush3.bf16.msra.mxu0 %v1076_v18  ;;  %v1113_v57 = vld [vmem:[%s1415_s1 + $0x1a0] sm:$0xff]   ;;  %v1117_v61 = vld [vmem:[%s1415_s1 + $0x1a8] sm:$0xff]   ;;  %v1119_v63 = vld [vmem:[%s1415_s1 + $0x1f0] sm:$0xff]  }
  0x15   :  { %970 = vmatpush3.bf16.msra.mxu1 %v1077_v19  ;;  %949 = vmatprep.subr.bf16.mxu0 %v1078_v20  ;;  %v1120_v0 = vld [vmem:[%s1415_s1 + $0x130] sm:$0xff]   ;;  %v1122_v2 = vld [vmem:[%s1415_s1 + $0x178] sm:$0xff]   ;;  %v1130_v13 = vld [vmem:[%s1417_s3] sm:$0xff]  }
  0x16   :  { %971 = vmatprep.subr.bf16.mxu1 %v1079_v21  ;;  %v1121_v1 = vld [vmem:[%s1415_s1 + $0x1b0] sm:$0xff]   ;;  %v1123_v3 = vld [vmem:[%s1415_s1 + $0x1f8] sm:$0xff]   ;;  %v1131_v14 = vld [vmem:[%s1417_s3 + $0x8] sm:$0xff]  }
  0x17   :  { %v1124_v4 = vld [vmem:[%s1415_s1 + $0x138] sm:$0xff]   ;;  %v25_v6 = vld [vmem:[%s1416_s0 + $0x10] sm:$0xff]  ;;  %v1134_v17 = vld [vmem:[%s1417_s3 + $0x20] sm:$0xff]  }
  0x18   :  { %950 = vmatpush3.bf16.msra.mxu0 %v1080_v22  ;;  %v1125_v5 = vld [vmem:[%s1415_s1 + $0x1b8] sm:$0xff]   ;;  %v862_v7 = vcombine.low %v25_v6, %v25_v6  ;;  %v863_v8 = vcombine.high %v25_v6, %v25_v6  ;;  %v1132_v15 = vld [vmem:[%s1417_s3 + $0x10] sm:$0xff]   ;;  %v1135_v18 = vld [vmem:[%s1417_s3 + $0x28] sm:$0xff]  }
  0x19   :  { %972 = vmatpush3.bf16.msra.mxu1 %v1081_v23  ;;  %951 = vmatprep.subr.bf16.mxu0 %v1082_v24  ;;  %v26_v9 = vld [vmem:[%s1416_s0 + $0x18] sm:$0xff]  ;;  %v1136_v19 = vld [vmem:[%s1417_s3 + $0x30] sm:$0xff]   ;;  %v857_v23 = vld [vmem:[%s1418_s2] ss:$0 sm:$0xff] }
  0x1a   :  { %973 = vmatprep.subr.bf16.mxu1 %v1083_v25  ;;  %v864_v10 = vcombine.low %v26_v9, %v26_v9  ;;  %v865_v11 = vcombine.high %v26_v9, %v26_v9  ;;  %v1133_v16 = vld [vmem:[%s1417_s3 + $0x18] sm:$0xff]  }
  0x1b   :  { %v1137_v20 = vld [vmem:[%s1417_s3 + $0x38] sm:$0xff]  }
  0x1c   :  { %952 = vmatpush3.bf16.msra.mxu0 %v1084_v26 }
  0x1d   :  { %974 = vmatpush3.bf16.msra.mxu1 %v1085_v27  ;;  %953 = vmatprep.subr.bf16.mxu0 %v1086_v28 }
  0x1e   :  { %975 = vmatprep.subr.bf16.mxu1 %v1087_v29 }
  0x20   :  { %954 = vmatpush3.bf16.msra.mxu0 %v1088_v30 }
  0x21   :  { %976 = vmatpush3.bf16.msra.mxu1 %v1089_v31  ;;  %983 = vmatprep.subr.bf16.mxu0 %v1094_v38 }
  0x22   :  { %1005 = vmatprep.subr.bf16.mxu1 %v1095_v39 }
  0x23   :  { %607 = vmatmul.mubr.bf16.vlgmr.msra.gmra.mrb[0].mxu0 %v858_v34 }
  0x24   :  { %647 = vmatmul.mubr.bf16.vlgmr.msra.gmra.mrb[0].mxu1 %v860_v36  ;;  %984 = vmatpush3.bf16.msra.mxu0 %v1096_v40 }
  0x25   :  { %1006 = vmatpush3.bf16.msra.mxu1 %v1097_v41  ;;  %985 = vmatprep.subr.bf16.mxu0 %v1098_v42 }
  0x26   :  { %1007 = vmatprep.subr.bf16.mxu1 %v1099_v43  ;;  %686 = vmatprep.mubr.bf16.mxu0 %v863_v8 }
  0x27   :  { %726 = vmatprep.mubr.bf16.mxu1 %v865_v11 }
  0x28   :  { %986 = vmatpush3.bf16.msra.mxu0 %v1100_v44 }
  0x29   :  { %1008 = vmatpush3.bf16.msra.mxu1 %v1101_v45  ;;  %987 = vmatprep.subr.bf16.mxu0 %v1102_v46 }
  0x2a   :  { %1009 = vmatprep.subr.bf16.mxu1 %v1103_v47 }
  0x2c   :  { %988 = vmatpush3.bf16.msra.mxu0 %v1104_v48  ;;  %v930_v48 = vld [vmem:[%s1420_s4] ss:$0 sm:$0xff] }
  0x2d   :  { %1010 = vmatpush3.bf16.msra.mxu1 %v1105_v49  ;;  %989 = vmatprep.subr.bf16.mxu0 %v1106_v50 }
  0x2e   :  { %1011 = vmatprep.subr.bf16.mxu1 %v1107_v51 }
  0x30   :  { %990 = vmatpush3.bf16.msra.mxu0 %v1108_v52 }
  0x31   :  { %1012 = vmatpush3.bf16.msra.mxu1 %v1109_v53  ;;  %991 = vmatprep.subr.bf16.mxu0 %v1110_v54 }
  0x32   :  { %1013 = vmatprep.subr.bf16.mxu1 %v1111_v55 }
  0x34   :  { %992 = vmatpush3.bf16.msra.mxu0 %v1112_v56 }
  0x35   :  { %1014 = vmatpush3.bf16.msra.mxu1 %v1113_v57  ;;  %993 = vmatprep.subr.bf16.mxu0 %v1114_v58 }
  0x36   :  { %1015 = vmatprep.subr.bf16.mxu1 %v1115_v59 }
  0x38   :  { %994 = vmatpush3.bf16.msra.mxu0 %v1116_v60 }
  0x39   :  { %1016 = vmatpush3.bf16.msra.mxu1 %v1117_v61  ;;  %995 = vmatprep.subr.bf16.mxu0 %v1118_v62 }
  0x3a   :  { %1017 = vmatprep.subr.bf16.mxu1 %v1119_v63 }
  0x3c   :  { %996 = vmatpush3.bf16.msra.mxu0 %v1120_v0 }
  0x3d   :  { %1018 = vmatpush3.bf16.msra.mxu1 %v1121_v1  ;;  %997 = vmatprep.subr.bf16.mxu0 %v1122_v2 }
  0x3e   :  { %1019 = vmatprep.subr.bf16.mxu1 %v1123_v3 }
  0x40   :  { %998 = vmatpush3.bf16.msra.mxu0 %v1124_v4 }
  0x41   :  { %1020 = vmatpush3.bf16.msra.mxu1 %v1125_v5  ;;  %1036 = vmatprep.subr.bf16.mxu0 %v1138_v12 }
  0x43   :  { %687 = vmatmul.mubr.bf16.vlgmr.msra.gmra.mrb[4].mxu0 %v862_v7 }
  0x44   :  { %727 = vmatmul.mubr.bf16.vlgmr.msra.gmra.mrb[4].mxu1 %v864_v10  ;;  %1037 = vmatpush3.bf16.msra.mxu0 %v1130_v13 }
  0x45   :  { %1038 = vmatprep.subr.bf16.mxu0 %v1138_v12  ;;  %1052 = vmatprep.mubr.msk.bf16.mxu0 %vm1139_vm0, %v1138_v12 }
  0x48   :  { %1039 = vmatpush3.bf16.msra.mxu0 %v1131_v14 }
  0x49   :  { %1040 = vmatprep.subr.bf16.mxu0 %v1138_v12 }
  0x4c   :  { %1041 = vmatpush3.bf16.msra.mxu0 %v1132_v15 }
  0x4d   :  { %1042 = vmatprep.subr.bf16.mxu0 %v1138_v12 }
  0x50   :  { %1043 = vmatpush3.bf16.msra.mxu0 %v1133_v16 }
  0x51   :  { %1044 = vmatprep.subr.bf16.mxu0 %v1138_v12 }
  0x54   :  { %1045 = vmatpush3.bf16.msra.mxu0 %v1134_v17 }
  0x55   :  { %1046 = vmatprep.subr.bf16.mxu0 %v1138_v12 }
  0x58   :  { %1047 = vmatpush3.bf16.msra.mxu0 %v1135_v18 }
  0x59   :  { %1048 = vmatprep.subr.bf16.mxu0 %v1138_v12 }
  0x5c   :  { %1049 = vmatpush3.bf16.msra.mxu0 %v1136_v19 }
  0x5d   :  { %1050 = vmatprep.subr.bf16.mxu0 %v1138_v12 }
  0x60   :  { %1051 = vmatpush3.bf16.msra.mxu0 %v1137_v20 }
  0xf6   :  { %v955_v21 = vpop.f32.mrb[0].mxu0 }
  0xf7   :  { %v977_v22 = vpop.f32.mrb[0].mxu1  ;;  %v956_v24 = vpop.f32.mrb[1].mxu0 }
  0xf8   :  { %v978_v25 = vpop.f32.mrb[1].mxu1  ;;  %v957_v26 = vadd.f32 %v956_v24, %v955_v21  ;;  %v958_v28 = vpop.f32.mrb[2].mxu0 }
  0xf9   :  { %v979_v27 = vadd.f32 %v978_v25, %v977_v22  ;;  %v980_v29 = vpop.f32.mrb[2].mxu1  ;;  %v959_v30 = vpop.f32.mrb[3].mxu0 }
  0xfa   :  { %v981_v31 = vpop.f32.mrb[3].mxu1  ;;  %v609_v32 = vadd.f32 %v957_v26, %v857_v23 }
  0xfc   :  { %v649_v33 = vadd.f32 %v979_v27, %v609_v32 }
 0x116   :  { %v999_v34 = vpop.f32.mrb[4].mxu0 }
 0x117   :  { %v1021_v35 = vpop.f32.mrb[4].mxu1  ;;  %v1000_v36 = vpop.f32.mrb[5].mxu0 }
 0x118   :  { %v1022_v37 = vpop.f32.mrb[5].mxu1  ;;  %v1001_v38 = vadd.f32 %v1000_v36, %v999_v34  ;;  %v1002_v40 = vpop.f32.mrb[6].mxu0 }
 0x119   :  { %v1023_v39 = vadd.f32 %v1022_v37, %v1021_v35  ;;  %v1024_v41 = vpop.f32.mrb[6].mxu1  ;;  %v1003_v42 = vpop.f32.mrb[7].mxu0 }
 0x11a   :  { %v1025_v43 = vpop.f32.mrb[7].mxu1  ;;  %v689_v44 = vadd.f32 %v1001_v38, %v649_v33 }
 0x11c   :  { %v729_v45 = vadd.f32 %v1023_v39, %v689_v44 }
 0x11e   :  { %v734_v46 = vmax.f32 %v729_v45, 0.0 }
 0x120   :  { %735 = vst [vmem:[%s1419_s5] sm:$0xff] %v734_v46  ;;  %v736_v47 = vpack.c.bf16 %v734_v46, %v734_v46 }
 0x122   :  { %1053 = vmatmul.mubr.bf16.vlgmr.msra.gmra.mrb[8].mxu0 %v736_v47 }
 0x1f5   :  { %v842_v49 = vpop.f32.mrb[8].mxu0 }
 0x1f6   :  { %v843_v50 = vadd.f32 %v930_v48, %v842_v49  ;;  %v1054_v51 = vpop.f32.mrb[9].mxu0 }
 0x1f7   :  { %v845_v52 = vpop.f32.mrb[10].mxu0 }
 0x1f8   :  { %848 = vst [vmem:[%s1421_s6] sm:$0xff] %v843_v50  ;;  %v1055_v53 = vpop.f32.mrb[11].mxu0 }

</bundles_post_ra>
